<compile_context>
chip_gen: v7x
topology: tpu7x:2x2x1
jax: 0.10.0
libtpu: 0.0.40
codegen_flags: <defaults>
</compile_context>

<pallas_src>
import functools

import jax
import jax.numpy as jnp
from jax.experimental import pallas as pl
from jax.experimental.pallas import tpu as pltpu


def ladder_encoder_kernel(
    x_ref,          # [B, in_p]        bf16 (full-resident)
    w1_ref,         # [in_p, tn]       bf16 (hidden column tile)
    gamma_ref,      # [1, tn]          f32
    beta_ref,       # [1, tn]          f32
    wh_ref,         # [tn, head_p]     bf16 (fused mu||var head row tile)
    bh_ref,         # [1, head_p]      f32
    act_out_ref,    # [B, tn]          f32
    heads_out_ref,  # [B, head_p]      f32 resident accumulator (mu | softplus(var) | pad)
    *, z_dim,
):
    j = pl.program_id(0)

    # ---- linear (bias dropped: cancelled by train-mode BN) ----
    h = jnp.dot(x_ref[...], w1_ref[...], preferred_element_type=jnp.float32)

    # ---- BatchNorm1d, training mode: batch mean / biased batch var, eps=1e-5.
    # Both reductions are taken directly from h so the XLU reduces can overlap.
    n = h.shape[0]
    inv_n = 1.0 / n
    s1 = jnp.sum(h, axis=0, keepdims=True)
    s2 = jnp.sum(h * h, axis=0, keepdims=True)
    mean = s1 * inv_n
    var = jnp.maximum(s2 * inv_n - mean * mean, 0.0)
    inv_std = jax.lax.rsqrt(var + 1e-5)
    bn = (h - mean) * (inv_std * gamma_ref[...]) + beta_ref[...]

    # ---- leaky_relu(0.1) ----
    act = jnp.where(bn >= 0.0, bn, 0.1 * bn)
    act_out_ref[...] = act.astype(act_out_ref.dtype)

    # ---- fused mu||var head: accumulate partial products over hidden tiles
    # straight into the resident f32 output slab (no separate scratch needed).
    @pl.when(j == 0)
    def _():
        heads_out_ref[...] = jnp.zeros_like(heads_out_ref)

    heads_out_ref[...] += jnp.dot(
        act.astype(wh_ref.dtype), wh_ref[...], preferred_element_type=jnp.float32
    )

    @pl.when(j == pl.num_programs(0) - 1)
    def _():
        heads = heads_out_ref[...] + bh_ref[...]
        # softplus (PyTorch threshold=20) only on the var half of the slab.
        col = jax.lax.broadcasted_iota(jnp.int32, heads.shape, dimension=1)
        is_var = jnp.logical_and(col >= z_dim, col < 2 * z_dim)
        sp = jnp.where(
            heads > 20.0,
            heads,
            jnp.log1p(jnp.exp(jnp.minimum(heads, 20.0))),
        )
        heads_out_ref[...] = jnp.where(is_var, sp, heads)


def _round_up(n, m):
    return ((n + m - 1) // m) * m


def ladder_encoder(x, params, *, tn=128):
    """x: [B, in_dim] float32.  Returns (act, mu, var) exactly like the PyTorch module."""
    B, in_dim = x.shape
    out_dim = params["w1"].shape[1]
    z_dim = params["wmu"].shape[1]

    # ---- lane-align everything to multiples of 128 ----
    tn = max(128, _round_up(tn, 128))
    in_p = _round_up(in_dim, 128)
    out_p = _round_up(out_dim, tn)
    head_p = _round_up(2 * z_dim, 128)
    grid = (out_p // tn,)

    bf16, f32 = jnp.bfloat16, jnp.float32

    x_p = jnp.pad(x, ((0, 0), (0, in_p - in_dim))).astype(bf16)
    w1_p = jnp.pad(
        params["w1"], ((0, in_p - in_dim), (0, out_p - out_dim))
    ).astype(bf16)
    gamma_p = jnp.pad(
        params["gamma"], ((0, 0), (0, out_p - out_dim)), constant_values=1.0
    ).astype(f32)
    beta_p = jnp.pad(params["beta"], ((0, 0), (0, out_p - out_dim))).astype(f32)

    # fused heads: [out_dim, 2*z_dim] -> padded [out_p, head_p]
    w_heads = jnp.concatenate([params["wmu"], params["wvar"]], axis=1)
    b_heads = jnp.concatenate([params["bmu"], params["bvar"]], axis=1)
    wh_p = jnp.pad(
        w_heads, ((0, out_p - out_dim), (0, head_p - 2 * z_dim))
    ).astype(bf16)
    bh_p = jnp.pad(b_heads, ((0, 0), (0, head_p - 2 * z_dim))).astype(f32)

    flops = 2 * B * in_p * out_p + 2 * B * out_p * head_p
    transcendentals = out_p + 2 * B * head_p  # rsqrt per feature; exp/log1p per head elem
    bytes_accessed = (
        2 * (B * in_p + in_p * out_p + out_p * head_p)          # bf16 inputs
        + 4 * (2 * out_p + head_p)                               # f32 gamma/beta/bias
        + 4 * (B * out_p + B * head_p)                           # f32 outputs
    )

    grid_spec = pltpu.PrefetchScalarGridSpec(
        num_scalar_prefetch=0,
        grid=grid,
        in_specs=[
            pl.BlockSpec((B, in_p), lambda j: (0, 0)),       # x (resident)
            pl.BlockSpec((in_p, tn), lambda j: (0, j)),      # W1 column tile
            pl.BlockSpec((1, tn), lambda j: (0, j)),         # gamma tile
            pl.BlockSpec((1, tn), lambda j: (0, j)),         # beta tile
            pl.BlockSpec((tn, head_p), lambda j: (j, 0)),    # fused head row tile
            pl.BlockSpec((1, head_p), lambda j: (0, 0)),     # fused head bias
        ],
        out_specs=(
            pl.BlockSpec((B, tn), lambda j: (0, j)),         # act tile
            pl.BlockSpec((B, head_p), lambda j: (0, 0)),     # heads slab (resident acc)
        ),
    )

    act_p, heads_p = pl.pallas_call(
        functools.partial(ladder_encoder_kernel, z_dim=z_dim),
        out_shape=(
            jax.ShapeDtypeStruct((B, out_p), jnp.float32),
            jax.ShapeDtypeStruct((B, head_p), jnp.float32),
        ),
        grid_spec=grid_spec,
        compiler_params=pltpu.CompilerParams(
            dimension_semantics=("arbitrary",),  # heads accumulate across this axis
        ),
        cost_estimate=pl.CostEstimate(
            flops=flops,
            transcendentals=transcendentals,
            bytes_accessed=bytes_accessed,
        ),
    )(x_p, w1_p, gamma_p, beta_p, wh_p, bh_p)

    act = act_p[:, :out_dim]
    mu = heads_p[:, :z_dim]
    var = heads_p[:, z_dim : 2 * z_dim]
    return act, mu, var


def init_params(key, in_dim, out_dim, z_dim):
    """Deterministic init mimicking PyTorch nn.Linear defaults (U(-1/sqrt(fan_in), ..))."""
    ks = jax.random.split(key, 6)

    def linear_init(kw, kb, fan_in, fan_out):
        bound = 1.0 / jnp.sqrt(fan_in)
        w = jax.random.uniform(kw, (fan_in, fan_out), jnp.float32, -bound, bound)
        b = jax.random.uniform(kb, (1, fan_out), jnp.float32, -bound, bound)
        return w, b

    w1, b1 = linear_init(ks[0], ks[1], in_dim, out_dim)
    wmu, bmu = linear_init(ks[2], ks[3], out_dim, z_dim)
    wvar, bvar = linear_init(ks[4], ks[5], out_dim, z_dim)
    return {
        "w1": w1, "b1": b1,
        "gamma": jnp.ones((1, out_dim), jnp.float32),
        "beta": jnp.zeros((1, out_dim), jnp.float32),
        "wmu": wmu, "bmu": bmu,
        "wvar": wvar, "bvar": bvar,
    }


if __name__ == "__main__":
    B, in_dim, out_dim, z_dim = 8, 32, 64, 16

    key = jax.random.PRNGKey(0)
    k_x, k_p = jax.random.split(key)
    x = jax.random.normal(k_x, (B, in_dim), jnp.float32)
    params = init_params(k_p, in_dim, out_dim, z_dim)

    act, mu, var = ladder_encoder(x, params)
    jax.block_until_ready((act, mu, var))

    # ---- plain-JAX reference (mirrors the kernel's bf16-input MXU math; keeps
    # the PyTorch b1 + centered-variance formulation, which the kernel's
    # b1-free / sumsq formulation must reproduce) ----
    bf16 = jnp.bfloat16
    h = jnp.dot(x.astype(bf16), params["w1"].astype(bf16),
                preferred_element_type=jnp.float32) + params["b1"]
    m = h.mean(0, keepdims=True)
    v = ((h - m) ** 2).mean(0, keepdims=True)
    bn = (h - m) * jax.lax.rsqrt(v + 1e-5) * params["gamma"] + params["beta"]
    act_ref = jnp.where(bn >= 0, bn, 0.1 * bn)
    act_b = act_ref.astype(bf16)
    mu_ref = jnp.dot(act_b, params["wmu"].astype(bf16),
                     preferred_element_type=jnp.float32) + params["bmu"]
    var_ref = jax.nn.softplus(
        jnp.dot(act_b, params["wvar"].astype(bf16),
                preferred_element_type=jnp.float32) + params["bvar"]
    )

    assert act.shape == (B, out_dim) and mu.shape == (B, z_dim) and var.shape == (B, z_dim)
    assert jnp.allclose(act, act_ref, atol=1e-2, rtol=1e-2)
    assert jnp.allclose(mu, mu_ref, atol=1e-2, rtol=1e-2)
    assert jnp.allclose(var, var_ref, atol=1e-2, rtol=1e-2)

    print("KERNEL_OK")
</pallas_src>

<mosaic_0001>
module attributes {stable_mosaic.version = 11 : i64} {
  func.func @ladder_encoder_kernel(%arg0: i32, %arg1: memref<8x128xbf16, #tpu.memory_space<vmem>>, %arg2: memref<128x128xbf16, #tpu.memory_space<vmem>>, %arg3: memref<1x128xf32, #tpu.memory_space<vmem>>, %arg4: memref<1x128xf32, #tpu.memory_space<vmem>>, %arg5: memref<128x128xbf16, #tpu.memory_space<vmem>>, %arg6: memref<1x128xf32, #tpu.memory_space<vmem>>, %arg7: memref<8x128xf32, #tpu.memory_space<vmem>>, %arg8: memref<8x128xf32, #tpu.memory_space<vmem>>) attributes {dimension_semantics = [#tpu.dimension_semantics<arbitrary>], iteration_bounds = array<i64: 1>, scalar_prefetch = 0 : i64, scratch_operands = 0 : i64, tpu.core_type = #tpu.core_type<tc>, window_params = [{pipeline_mode = #tpu.pipeline_mode<synchronous>, transform_indices = @transform_0, window_bounds = array<i64: 8, 128>}, {transform_indices = @transform_1, window_bounds = array<i64: 128, 128>}, {transform_indices = @transform_2, window_bounds = array<i64: 1, 128>}, {transform_indices = @transform_3, window_bounds = array<i64: 1, 128>}, {transform_indices = @transform_4, window_bounds = array<i64: 128, 128>}, {pipeline_mode = #tpu.pipeline_mode<synchronous>, transform_indices = @transform_5, window_bounds = array<i64: 1, 128>}, {transform_indices = @transform_6, window_bounds = array<i64: 8, 128>}, {pipeline_mode = #tpu.pipeline_mode<synchronous>, transform_indices = @transform_7, window_bounds = array<i64: 8, 128>}]} {
    %c0 = arith.constant 0 : index
    %c0_0 = arith.constant 0 : index
    %0 = vector.load %arg1[%c0, %c0_0] : memref<8x128xbf16, #tpu.memory_space<vmem>>, vector<8x128xbf16>
    %c0_1 = arith.constant 0 : index
    %c0_2 = arith.constant 0 : index
    %1 = vector.load %arg2[%c0_1, %c0_2] : memref<128x128xbf16, #tpu.memory_space<vmem>>, vector<128x128xbf16>
    %cst = arith.constant dense<0.000000e+00> : vector<8x128xf32>
    %2 = tpu.matmul %0, %1, %cst {dimension_numbers = #tpu.dot_dimension_numbers<[1], [0], [0], [1], [0, 0, 1, 1], [], []>} : vector<8x128xbf16>, vector<128x128xbf16>, vector<8x128xf32> -> vector<8x128xf32>
    %cst_3 = arith.constant dense<0.000000e+00> : vector<128xf32>
    %3 = vector.multi_reduction <add>, %2, %cst_3 [0] : vector<8x128xf32> to vector<128xf32>
    %4 = vector.shape_cast %3 : vector<128xf32> to vector<1x128xf32>
    %5 = arith.mulf %2, %2 : vector<8x128xf32>
    %cst_4 = arith.constant dense<0.000000e+00> : vector<128xf32>
    %6 = vector.multi_reduction <add>, %5, %cst_4 [0] : vector<8x128xf32> to vector<128xf32>
    %7 = vector.shape_cast %6 : vector<128xf32> to vector<1x128xf32>
    %cst_5 = arith.constant 1.250000e-01 : f32
    %8 = vector.broadcast %cst_5 : f32 to vector<1x128xf32>
    %9 = arith.mulf %4, %8 : vector<1x128xf32>
    %cst_6 = arith.constant 1.250000e-01 : f32
    %10 = vector.broadcast %cst_6 : f32 to vector<1x128xf32>
    %11 = arith.mulf %7, %10 : vector<1x128xf32>
    %12 = arith.mulf %9, %9 : vector<1x128xf32>
    %13 = arith.subf %11, %12 : vector<1x128xf32>
    %cst_7 = arith.constant 0.000000e+00 : f32
    %14 = vector.broadcast %cst_7 : f32 to vector<1x128xf32>
    %15 = arith.maximumf %13, %14 : vector<1x128xf32>
    %cst_8 = arith.constant 9.99999974E-6 : f32
    %16 = vector.broadcast %cst_8 : f32 to vector<1x128xf32>
    %17 = arith.addf %15, %16 : vector<1x128xf32>
    %18 = math.rsqrt %17 : vector<1x128xf32>
    %19 = vector.broadcast %9 : vector<1x128xf32> to vector<8x128xf32>
    %20 = arith.subf %2, %19 : vector<8x128xf32>
    %c0_9 = arith.constant 0 : index
    %c0_10 = arith.constant 0 : index
    %21 = vector.load %arg3[%c0_9, %c0_10] : memref<1x128xf32, #tpu.memory_space<vmem>>, vector<1x128xf32>
    %22 = arith.mulf %18, %21 : vector<1x128xf32>
    %23 = vector.broadcast %22 : vector<1x128xf32> to vector<8x128xf32>
    %24 = arith.mulf %20, %23 : vector<8x128xf32>
    %c0_11 = arith.constant 0 : index
    %c0_12 = arith.constant 0 : index
    %25 = vector.load %arg4[%c0_11, %c0_12] : memref<1x128xf32, #tpu.memory_space<vmem>>, vector<1x128xf32>
    %26 = vector.broadcast %25 : vector<1x128xf32> to vector<8x128xf32>
    %27 = arith.addf %24, %26 : vector<8x128xf32>
    %cst_13 = arith.constant 0.000000e+00 : f32
    %28 = vector.broadcast %cst_13 : f32 to vector<8x128xf32>
    %29 = arith.cmpf oge, %27, %28 : vector<8x128xf32>
    %cst_14 = arith.constant 1.000000e-01 : f32
    %30 = vector.broadcast %cst_14 : f32 to vector<8x128xf32>
    %31 = arith.mulf %30, %27 : vector<8x128xf32>
    %32 = arith.select %29, %27, %31 : vector<8x128xi1>, vector<8x128xf32>
    %c0_15 = arith.constant 0 : index
    %c0_16 = arith.constant 0 : index
    %33 = vector.load %arg7[%c0_15, %c0_16] : memref<8x128xf32, #tpu.memory_space<vmem>>, vector<8x128xf32>
    tpu.vector_store %arg7[%c0_15, %c0_16], %32 {strides = array<i32>} : memref<8x128xf32, #tpu.memory_space<vmem>>, vector<8x128xf32>,
    %c0_i32 = arith.constant 0 : i32
    %34 = arith.cmpi eq, %arg0, %c0_i32 : i32
    %35 = arith.extui %34 : i1 to i32
    %c0_i32_17 = arith.constant 0 : i32
    %36 = arith.cmpi ne, %35, %c0_i32_17 : i32
    scf.if %36 {
      %cst_27 = arith.constant 0.000000e+00 : f32
      %46 = vector.broadcast %cst_27 : f32 to vector<8x128xf32>
      %c0_28 = arith.constant 0 : index
      %c0_29 = arith.constant 0 : index
      %47 = vector.load %arg8[%c0_28, %c0_29] : memref<8x128xf32, #tpu.memory_space<vmem>>, vector<8x128xf32>
      tpu.vector_store %arg8[%c0_28, %c0_29], %46 {strides = array<i32>} : memref<8x128xf32, #tpu.memory_space<vmem>>, vector<8x128xf32>,
    } else {
    }
    %c0_18 = arith.constant 0 : index
    %c0_19 = arith.constant 0 : index
    %37 = vector.load %arg8[%c0_18, %c0_19] : memref<8x128xf32, #tpu.memory_space<vmem>>, vector<8x128xf32>
    %38 = arith.truncf %32 : vector<8x128xf32> to vector<8x128xbf16>
    %c0_20 = arith.constant 0 : index
    %c0_21 = arith.constant 0 : index
    %39 = vector.load %arg5[%c0_20, %c0_21] : memref<128x128xbf16, #tpu.memory_space<vmem>>, vector<128x128xbf16>
    %cst_22 = arith.constant dense<0.000000e+00> : vector<8x128xf32>
    %40 = tpu.matmul %38, %39, %cst_22 {dimension_numbers = #tpu.dot_dimension_numbers<[1], [0], [0], [1], [0, 0, 1, 1], [], []>} : vector<8x128xbf16>, vector<128x128xbf16>, vector<8x128xf32> -> vector<8x128xf32>
    %41 = arith.addf %37, %40 : vector<8x128xf32>
    %c0_23 = arith.constant 0 : index
    %c0_24 = arith.constant 0 : index
    %42 = vector.load %arg8[%c0_23, %c0_24] : memref<8x128xf32, #tpu.memory_space<vmem>>, vector<8x128xf32>
    tpu.vector_store %arg8[%c0_23, %c0_24], %41 {strides = array<i32>} : memref<8x128xf32, #tpu.memory_space<vmem>>, vector<8x128xf32>,
    %c0_i32_25 = arith.constant 0 : i32
    %43 = arith.cmpi eq, %arg0, %c0_i32_25 : i32
    %44 = arith.extui %43 : i1 to i32
    %c0_i32_26 = arith.constant 0 : i32
    %45 = arith.cmpi ne, %44, %c0_i32_26 : i32
    scf.if %45 {
      %c0_27 = arith.constant 0 : index
      %c0_28 = arith.constant 0 : index
      %46 = vector.load %arg8[%c0_27, %c0_28] : memref<8x128xf32, #tpu.memory_space<vmem>>, vector<8x128xf32>
      %c0_29 = arith.constant 0 : index
      %c0_30 = arith.constant 0 : index
      %47 = vector.load %arg6[%c0_29, %c0_30] : memref<1x128xf32, #tpu.memory_space<vmem>>, vector<1x128xf32>
      %48 = vector.broadcast %47 : vector<1x128xf32> to vector<8x128xf32>
      %49 = arith.addf %46, %48 : vector<8x128xf32>
      %50 = tpu.iota {dimensions = array<i32: 1>} : vector<8x128xi32>
      %c16_i32 = arith.constant 16 : i32
      %51 = vector.broadcast %c16_i32 : i32 to vector<8x128xi32>
      %52 = arith.cmpi sge, %50, %51 : vector<8x128xi32>
      %c32_i32 = arith.constant 32 : i32
      %53 = vector.broadcast %c32_i32 : i32 to vector<8x128xi32>
      %54 = arith.cmpi slt, %50, %53 : vector<8x128xi32>
      %55 = arith.andi %52, %54 : vector<8x128xi1>
      %cst_31 = arith.constant 2.000000e+01 : f32
      %56 = vector.broadcast %cst_31 : f32 to vector<8x128xf32>
      %57 = arith.cmpf ogt, %49, %56 : vector<8x128xf32>
      %cst_32 = arith.constant 2.000000e+01 : f32
      %58 = vector.broadcast %cst_32 : f32 to vector<8x128xf32>
      %59 = arith.minimumf %49, %58 : vector<8x128xf32>
      %60 = math.exp %59 : vector<8x128xf32>
      %61 = math.log1p %60 : vector<8x128xf32>
      %62 = arith.select %57, %49, %61 : vector<8x128xi1>, vector<8x128xf32>
      %63 = arith.select %55, %62, %49 : vector<8x128xi1>, vector<8x128xf32>
      %c0_33 = arith.constant 0 : index
      %c0_34 = arith.constant 0 : index
      %64 = vector.load %arg8[%c0_33, %c0_34] : memref<8x128xf32, #tpu.memory_space<vmem>>, vector<8x128xf32>
      tpu.vector_store %arg8[%c0_33, %c0_34], %63 {strides = array<i32>} : memref<8x128xf32, #tpu.memory_space<vmem>>, vector<8x128xf32>,
    } else {
    }
    return
  }
  func.func @transform_0(%arg0: i32) -> (i32, i32) {
    %c0_i32 = arith.constant 0 : i32
    %c0_i32_0 = arith.constant 0 : i32
    %c0_i32_1 = arith.constant 0 : i32
    return %c0_i32, %c0_i32_0 : i32, i32
  }
  func.func @transform_1(%arg0: i32) -> (i32, i32) {
    %c0_i32 = arith.constant 0 : i32
    %c0_i32_0 = arith.constant 0 : i32
    return %c0_i32, %arg0 : i32, i32
  }
  func.func @transform_2(%arg0: i32) -> (i32, i32) {
    %c0_i32 = arith.constant 0 : i32
    %c0_i32_0 = arith.constant 0 : i32
    return %c0_i32, %arg0 : i32, i32
  }
  func.func @transform_3(%arg0: i32) -> (i32, i32) {
    %c0_i32 = arith.constant 0 : i32
    %c0_i32_0 = arith.constant 0 : i32
    return %c0_i32, %arg0 : i32, i32
  }
  func.func @transform_4(%arg0: i32) -> (i32, i32) {
    %c0_i32 = arith.constant 0 : i32
    %c0_i32_0 = arith.constant 0 : i32
    return %arg0, %c0_i32 : i32, i32
  }
  func.func @transform_5(%arg0: i32) -> (i32, i32) {
    %c0_i32 = arith.constant 0 : i32
    %c0_i32_0 = arith.constant 0 : i32
    %c0_i32_1 = arith.constant 0 : i32
    return %c0_i32, %c0_i32_0 : i32, i32
  }
  func.func @transform_6(%arg0: i32) -> (i32, i32) {
    %c0_i32 = arith.constant 0 : i32
    %c0_i32_0 = arith.constant 0 : i32
    return %c0_i32, %arg0 : i32, i32
  }
  func.func @transform_7(%arg0: i32) -> (i32, i32) {
    %c0_i32 = arith.constant 0 : i32
    %c0_i32_0 = arith.constant 0 : i32
    %c0_i32_1 = arith.constant 0 : i32
    return %c0_i32, %c0_i32_0 : i32, i32
  }
}

</mosaic_0001>

<bundles_post_ra>
// kernel: tpu_custom_call.1
= control target key start
LH: loop header
LB: loop body
LE: loop exit
PB: predicated region body
PF: predicated region fallthrough
CT: control target
= control target key end

     0   :  { %13 = vsyncpa [#allocation3], 0  ;;  %s737_s0 = inlined_call_operand.hbm [shape: bf16[8,128], index: 0, kind: input, shape index: {}]   ;;  %s738_s1 = inlined_call_operand.hbm [shape: bf16[128,128], index: 1, kind: input, shape index: {}]   ;;  %s739_s2 = inlined_call_operand.vmem [shape: f32[1,128], index: 2, kind: input, shape index: {}]   ;;  %s740_s3 = inlined_call_operand.vmem [shape: f32[1,128], index: 3, kind: input, shape index: {}]   ;;  %s741_s4 = inlined_call_operand.hbm [shape: bf16[128,128], index: 4, kind: input, shape index: {}]   ;;  %s742_s5 = inlined_call_operand.vmem [shape: f32[1,128], index: 5, kind: input, shape index: {}]   ;;  %s743_s6 = inlined_call_operand.hbm [shape: f32[8,128], index: 6, kind: output, shape index: {0}]   ;;  %s744_s7 = inlined_call_operand.hbm [shape: f32[8,128], index: 7, kind: output, shape index: {1}]  }
   0x1   :  { %14 = vsyncpa [#allocation6], 0 }
   0x2   :  { %15 = vsyncpa [#allocation4], 0 }
   0x3   :  { %16 = vsyncpa [#allocation10], 0  ;;  %s613_s24 = smov [#allocation5]   ;;  %s495_s28 = scalar_lea.hbm %s738_s1, 1024 }
   0x4   :  { %s32_s25 = sshll.u32 %s613_s24, 4  ;;  %p496_p0 = scmp.ne.s32.totalorder %s738_s1, %s495_s28  ;;  %s33_s25 = int_to_ptr.vmem [resolvable:$true] %s32_s25 }
   0x5   :  { %p499_p1 = scmp.lt.u32.totalorder %s495_s28, %s738_s1 }
   0x7   :  { %p501_p2 = pnand %p499_p1, %p496_p0 }
   0x9   :  { %504 = shalt.err (!%p501_p2)
}
   0xa   :  { %s505_s10 = scalar_lea.vmem %s33_s25, 1024  ;;  %p510_p4 = scmp.lt.s32.totalorder %s33_s25, %s33_s25 }
   0xb   :  { %p506_p3 = scmp.ne.s32.totalorder %s33_s25, %s505_s10  ;;  %p511_p5 = scmp.lt.s32.totalorder %s505_s10, %s505_s10 }
   0xd   :  { %p512_p6 = por %p511_p5, %p510_p4 }
   0xf   :  { %p513_p7 = pnand %p512_p6, %p506_p3 }
  0x11   :  { %516 = shalt.err (!%p513_p7)
}
  0x12   :  { %s614_s11 = smov 64   ;;  %s615_s12 = smov 4  }
  0x13   :  { %38 = dma.hbm_to_vmem [thread:$0]  %s738_s1, 1024, %s33_s25, [#allocation6], %s614_s11, %s614_s11, %s615_s12  }
  0x14   :  { %s616_s15 = smov [#allocation2]   ;;  %s617_s17 = smov [#allocation7]  }
  0x15   :  { %s23_s16 = sshll.u32 %s616_s15, 4  ;;  %s48_s18 = sshll.u32 %s617_s17, 4  ;;  %s24_s16 = int_to_ptr.vmem [resolvable:$true] %s23_s16  ;;  %s49_s18 = int_to_ptr.vmem [resolvable:$true] %s48_s18 }
  0x16   :  { %s517_s21 = scalar_lea.hbm %s737_s0, 64 }
  0x17   :  { %p518_p8 = scmp.ne.s32.totalorder %s737_s0, %s517_s21  ;;  %p521_p9 = scmp.lt.u32.totalorder %s517_s21, %s737_s0 }
  0x19   :  { %p523_p10 = pnand %p521_p9, %p518_p8 }
  0x1b   :  { %526 = shalt.err (!%p523_p10)
}
  0x1c   :  { %s527_s1 = scalar_lea.vmem %s24_s16, 64  ;;  %p532_p12 = scmp.lt.s32.totalorder %s24_s16, %s24_s16 }
  0x1d   :  { %p528_p11 = scmp.ne.s32.totalorder %s24_s16, %s527_s1  ;;  %p533_p13 = scmp.lt.s32.totalorder %s527_s1, %s527_s1 }
  0x1f   :  { %p534_p0 = por %p533_p13, %p532_p12 }
  0x21   :  { %p535_p1 = pnand %p534_p0, %p528_p11 }
  0x23   :  { %538 = shalt.err (!%p535_p1)
}
  0x24   :  { %26 = dma.hbm_to_vmem [thread:$0]  %s737_s0, 64, %s24_s16, [#allocation3]  }
  0x25   :  { %s539_s30 = scalar_lea.hbm %s741_s4, 1024 }
  0x26   :  { %p540_p2 = scmp.ne.s32.totalorder %s741_s4, %s539_s30  ;;  %p543_p3 = scmp.lt.u32.totalorder %s539_s30, %s741_s4 }
  0x28   :  { %p545_p4 = pnand %p543_p3, %p540_p2 }
  0x2a   :  { %548 = shalt.err (!%p545_p4)
}
  0x2b   :  { %s549_s14 = scalar_lea.vmem %s49_s18, 1024  ;;  %p554_p6 = scmp.lt.s32.totalorder %s49_s18, %s49_s18 }
  0x2c   :  { %p550_p5 = scmp.ne.s32.totalorder %s49_s18, %s549_s14  ;;  %p555_p7 = scmp.lt.s32.totalorder %s549_s14, %s549_s14 }
  0x2e   :  { %p556_p8 = por %p555_p7, %p554_p6 }
  0x30   :  { %p557_p9 = pnand %p556_p8, %p550_p5 }
  0x32   :  { %560 = shalt.err (!%p557_p9)
}
  0x33   :  { %54 = dma.hbm_to_vmem [thread:$0]  %s741_s4, 1024, %s49_s18, [#allocation6], %s614_s11, %s614_s11, %s615_s12  }
  0x34   :  { %605 = dma.done.wait [#allocation3], 64  }
  0x35   :  { %606 = vsyncadd [#allocation3], 4294967232 }
  0x36   :  { %607 = dma.done.wait [#allocation6], 2048  }
  0x37   :  { %608 = vsyncadd [#allocation6], 4294965248  ;;  %v618_v0 = vmov 0.0   ;;  %vm619_vm0 = vmmov 0   ;;  %v473_v1 = vld [vmem:[#allocation5] sm:$0xff]   ;;  %v474_v2 = vld [vmem:[#allocation5 + $0x8] sm:$0xff]   ;;  %v195_v41 = vlaneseq }
  0x38   :  { %424 = vmatprep.subr.bf16.mxu0 %v618_v0  ;;  %440 = vmatprep.mubr.msk.bf16.mxu0 %vm619_vm0, %v618_v0  ;;  %v475_v3 = vld [vmem:[#allocation5 + $0x10] sm:$0xff]   ;;  %v476_v4 = vld [vmem:[#allocation5 + $0x18] sm:$0xff]   ;;  %v477_v5 = vld [vmem:[#allocation5 + $0x20] sm:$0xff]   ;;  %s620_s17 = smov [#allocation8]  }
  0x39   :  { %444 = vmatprep.subr.bf16.mxu1 %v618_v0  ;;  %460 = vmatprep.mubr.msk.bf16.mxu1 %vm619_vm0, %v618_v0  ;;  %v478_v6 = vld [vmem:[#allocation5 + $0x28] sm:$0xff]   ;;  %v479_v7 = vld [vmem:[#allocation5 + $0x30] sm:$0xff]   ;;  %v480_v8 = vld [vmem:[#allocation5 + $0x38] sm:$0xff]   ;;  %v196_v42 = vshrl.u32 %v195_v41, 7  ;;  %s364_s18 = sshll.u32 %s620_s17, 4  ;;  %s365_s18 = int_to_ptr.vmem [resolvable:$true] %s364_s18 }
  0x3a   :  { %425 = vmatpush3.bf16.msra.mxu0 %v473_v1  ;;  %v67_v9 = vld [vmem:[#allocation2] sm:$0xf]  ;;  %v481_v10 = vld [vmem:[#allocation7] sm:$0xff]   ;;  %v482_v11 = vld [vmem:[#allocation7 + $0x8] sm:$0xff]   ;;  %p566_p11 = scmp.lt.s32.totalorder %s365_s18, %s365_s18 }
  0x3b   :  { %426 = vmatprep.subr.bf16.mxu0 %v618_v0  ;;  %445 = vmatpush3.bf16.msra.mxu1 %v481_v10  ;;  %v483_v12 = vld [vmem:[#allocation7 + $0x10] sm:$0xff]   ;;  %v484_v13 = vld [vmem:[#allocation7 + $0x18] sm:$0xff]   ;;  %v485_v14 = vld [vmem:[#allocation7 + $0x20] sm:$0xff]   ;;  %v197_v44 = vsub.s32 0, %v196_v42 }
  0x3c   :  { %446 = vmatprep.subr.bf16.mxu1 %v618_v0  ;;  %v486_v15 = vld [vmem:[#allocation7 + $0x28] sm:$0xff]   ;;  %v487_v16 = vld [vmem:[#allocation7 + $0x30] sm:$0xff]   ;;  %v488_v17 = vld [vmem:[#allocation7 + $0x38] sm:$0xff]  }
  0x3d   :  { %v193_v43 = vld [vmem:[%s739_s2] sm:$0x1]  ;;  %s561_s2 = scalar_lea.vmem %s365_s18, 128 }
  0x3e   :  { %427 = vmatpush3.bf16.msra.mxu0 %v474_v2  ;;  %v396_v49 = vld [vmem:[%s740_s3] ss:$0 sm:$0xff]  ;;  %p562_p10 = scmp.ne.s32.totalorder %s365_s18, %s561_s2  ;;  %p567_p12 = scmp.lt.s32.totalorder %s561_s2, %s561_s2 }
  0x3f   :  { %428 = vmatprep.subr.bf16.mxu0 %v618_v0  ;;  %447 = vmatpush3.bf16.msra.mxu1 %v482_v11 }
  0x40   :  { %448 = vmatprep.subr.bf16.mxu1 %v618_v0  ;;  %p568_p13 = por %p567_p12, %p566_p11 }
  0x42   :  { %429 = vmatpush3.bf16.msra.mxu0 %v475_v3  ;;  %p569_p0 = pnand %p568_p13, %p562_p10 }
  0x43   :  { %430 = vmatprep.subr.bf16.mxu0 %v618_v0  ;;  %449 = vmatpush3.bf16.msra.mxu1 %v483_v12 }
  0x44   :  { %450 = vmatprep.subr.bf16.mxu1 %v618_v0 }
  0x46   :  { %431 = vmatpush3.bf16.msra.mxu0 %v476_v4 }
  0x47   :  { %432 = vmatprep.subr.bf16.mxu0 %v618_v0  ;;  %451 = vmatpush3.bf16.msra.mxu1 %v484_v13 }
  0x48   :  { %452 = vmatprep.subr.bf16.mxu1 %v618_v0 }
  0x4a   :  { %433 = vmatpush3.bf16.msra.mxu0 %v477_v5 }
  0x4b   :  { %434 = vmatprep.subr.bf16.mxu0 %v618_v0  ;;  %453 = vmatpush3.bf16.msra.mxu1 %v485_v14 }
  0x4c   :  { %454 = vmatprep.subr.bf16.mxu1 %v618_v0 }
  0x4e   :  { %435 = vmatpush3.bf16.msra.mxu0 %v478_v6 }
  0x4f   :  { %436 = vmatprep.subr.bf16.mxu0 %v618_v0  ;;  %455 = vmatpush3.bf16.msra.mxu1 %v486_v15 }
  0x50   :  { %456 = vmatprep.subr.bf16.mxu1 %v618_v0 }
  0x52   :  { %437 = vmatpush3.bf16.msra.mxu0 %v479_v7 }
  0x53   :  { %438 = vmatprep.subr.bf16.mxu0 %v618_v0  ;;  %457 = vmatpush3.bf16.msra.mxu1 %v487_v16 }
  0x54   :  { %458 = vmatprep.subr.bf16.mxu1 %v618_v0 }
  0x56   :  { %439 = vmatpush3.bf16.msra.mxu0 %v480_v8 }
  0x57   :  { %459 = vmatpush3.bf16.msra.mxu1 %v488_v17 }
  0x59   :  { %441 = vmatmul.mubr.bf16.vlgmr.msra.gmra.mrb[0].mxu0 %v67_v9 }
 0x12c   :  { %v166_v18 = vpop.f32.mrb[0].mxu0 }
 0x12d   :  { %v172_v19 = vrot.slane %v166_v18, 4  ;;  %v178_v20 = vmul.f32 %v166_v18, %v166_v18  ;;  %v442_v21 = vpop.f32.mrb[1].mxu0 }
 0x12e   :  { %v169_v22 = vpop.f32.mrb[2].mxu0 }
 0x12f   :  { %v173_v23 = vadd.f32 %v172_v19, %v166_v18  ;;  %v179_v24 = vrot.slane %v178_v20, 4  ;;  %v443_v25 = vpop.f32.mrb[3].mxu0 }
 0x131   :  { %v174_v26 = vrot.slane %v173_v23, 2  ;;  %v180_v27 = vadd.f32 %v179_v24, %v178_v20 }
 0x133   :  { %v175_v28 = vadd.f32 %v174_v26, %v173_v23  ;;  %v181_v29 = vrot.slane %v180_v27, 2 }
 0x135   :  { %v176_v30 = vrot.slane %v175_v28, 1  ;;  %v182_v31 = vadd.f32 %v181_v29, %v180_v27 }
 0x137   :  { %v177_v32 = vadd.f32 %v176_v30, %v175_v28  ;;  %v183_v33 = vrot.slane %v182_v31, 1 }
 0x139   :  { %v184_v34 = vadd.f32 %v183_v33, %v182_v31  ;;  %v185_v35 = vmul.f32 0.125, %v177_v32 }
 0x13b   :  { %v186_v36 = vmul.f32 0.125, %v184_v34  ;;  %v187_v37 = vmul.f32 %v185_v35, %v185_v35  ;;  %v192_v47 = vsub.f32 %v166_v18, %v185_v35 }
 0x13d   :  { %v188_v38 = vsub.f32 %v186_v36, %v187_v37 }
 0x13f   :  { %v189_v39 = vmax.f32 %v188_v38, 0.0 }
 0x141   :  { %v190_v40 = vadd.f32 1e-05, %v189_v39 }
 0x143   :  { %489 = vrsqrt.f32 %v190_v40 }
 0x14d   :  { %v490_v45 = vpop.eup %489 }
 0x14e   :  { %v194_v46 = vmul.f32 %v490_v45, %v193_v43 }
 0x150   :  { %v198_v48 = vrot.slane %v194_v46, %v197_v44 }
 0x152   :  { %v199_v50 = vmul.f32 %v198_v48, %v192_v47 }
 0x154   :  { %v207_v51 = vadd.f32 %v396_v49, %v199_v50 }
 0x156   :  { %vm208_vm1 = vcmp.ge.f32.partialorder %v207_v51, 0.0  ;;  %v209_v52 = vmul.f32 0.1, %v207_v51 }
 0x158   :  { %v210_v53 = vsel %vm208_vm1, %v207_v51, %v209_v52 }
 0x159   :  { %v218_v54 = vpack.c.bf16 %v210_v53, %v210_v53  ;;  %211 = vst [vmem:[#allocation8] sm:$0xff] %v210_v53 }
 0x15b   :  { %461 = vmatmul.mubr.bf16.vlgmr.msra.gmra.mrb[0].mxu1 %v218_v54 }
 0x15c   :  { %572 = shalt.err (!%p569_p0)
}
 0x15d   :  { %s573_s20 = scalar_lea.hbm %s743_s6, 128 }
 0x15e   :  { %p574_p1 = scmp.ne.s32.totalorder %s743_s6, %s573_s20  ;;  %p577_p2 = scmp.lt.u32.totalorder %s573_s20, %s743_s6 }
 0x160   :  { %p579_p3 = pnand %p577_p2, %p574_p1 }
 0x162   :  { %582 = shalt.err (!%p579_p3)
}
 0x163   :  { %367 = dma.vmem_to_hbm [thread:$0]  %s365_s18, 128, %s743_s6, [#allocation4]   ;;  %v405_v56 = vld [vmem:[%s742_s5] ss:$0 sm:$0xff]  ;;  %v338_v2 = vand.u32 127, %v195_v41 }
 0x164   :  { %s621_s5 = smov [#allocation9]  }
 0x165   :  { %vm339_vm2 = vcmp.ge.s32.totalorder %v338_v2, 16  ;;  %vm340_vm3 = vcmp.lt.s32.totalorder %v338_v2, 32  ;;  %s374_s6 = sshll.u32 %s621_s5, 4  ;;  %s375_s6 = int_to_ptr.vmem [resolvable:$true] %s374_s6 }
 0x166   :  { %vm341_vm4 = vmand %vm339_vm2, %vm340_vm3  ;;  %s583_s28 = scalar_lea.vmem %s375_s6, 128  ;;  %p588_p5 = scmp.lt.s32.totalorder %s375_s6, %s375_s6 }
 0x167   :  { %p584_p4 = scmp.ne.s32.totalorder %s375_s6, %s583_s28  ;;  %p589_p6 = scmp.lt.s32.totalorder %s583_s28, %s583_s28 }
 0x169   :  { %p590_p7 = por %p589_p6, %p588_p5 }
 0x16b   :  { %p591_p8 = pnand %p590_p7, %p584_p4 }
 0x22e   :  { %v317_v55 = vpop.f32.mrb[0].mxu1 }
 0x22f   :  { %v462_v57 = vpop.f32.mrb[1].mxu1  ;;  %v336_v60 = vadd.f32 %v405_v56, %v317_v55 }
 0x230   :  { %v320_v58 = vpop.f32.mrb[2].mxu1 }
 0x231   :  { %v463_v59 = vpop.f32.mrb[3].mxu1  ;;  %v343_v61 = vmin.f32 %v336_v60, 20.0  ;;  %vm342_vm6 = vcmp.gt.f32.partialorder %v336_v60, 20.0 }
 0x233   :  { %v344_v62 = vmul.f32 1.442695, %v343_v61 }
 0x235   :  { %491 = vpow2.f32 %v344_v62 }
 0x23f   :  { %v492_v63 = vpop.eup %491 }
 0x240   :  { %v346_v0 = vadd.f32 1.0, %v492_v63  ;;  %v349_v1 = vmul.f32 -0.5, %v492_v63  ;;  %v352_v4 = vand.u32 2147483647, %v492_v63 }
 0x242   :  { %493 = vlog2.f32 %v346_v0  ;;  %v350_v3 = vadd.f32 1.0, %v349_v1  ;;  %vm353_vm5 = vcmp.lt.f32.partialorder %v352_v4, 0.0004427343 }
 0x244   :  { %v351_v7 = vmul.f32 %v492_v63, %v350_v3 }
 0x24c   :  { %v494_v5 = vpop.eup %493 }
 0x24d   :  { %v348_v6 = vmul.f32 0.6931472, %v494_v5 }
 0x24f   :  { %v354_v8 = vsel %vm353_vm5, %v351_v7, %v348_v6 }
 0x250   :  { %v355_v9 = vsel %vm342_vm6, %v336_v60, %v354_v8 }
 0x251   :  { %v356_v10 = vsel %vm341_vm4, %v355_v9, %v336_v60 }
 0x252   :  { %357 = vst [vmem:[#allocation9] sm:$0xff] %v356_v10 }
 0x253   :  { %594 = shalt.err (!%p591_p8)
}
 0x254   :  { %s595_s8 = scalar_lea.hbm %s744_s7, 128 }
 0x255   :  { %p596_p9 = scmp.ne.s32.totalorder %s744_s7, %s595_s8  ;;  %p599_p10 = scmp.lt.u32.totalorder %s595_s8, %s744_s7 }
 0x257   :  { %p601_p11 = pnand %p599_p10, %p596_p9 }
 0x259   :  { %604 = shalt.err (!%p601_p11)
}
 0x25a   :  { %377 = dma.vmem_to_hbm [thread:$0]  %s375_s6, 128, %s744_s7, [#allocation10]  }
 0x25b   :  { %609 = dma.done.wait [#allocation4], 128  }
 0x25c   :  { %610 = vsyncadd [#allocation4], 4294967168 }
 0x25d   :  { %611 = dma.done.wait [#allocation10], 128  }
 0x25e   :  { %612 = vsyncadd [#allocation10], 4294967168 }
 0x25f   :  { %384 = vsyncpa [#allocation3], 1 }
 0x260   :  { %385 = vsyncpa [#allocation6], 1 }
 0x261   :  { %386 = vsyncpa [#allocation4], 1 }
 0x262   :  { %387 = vsyncpa [#allocation10], 1 }

</bundles_post_ra>
